<compile_context>
chip_gen: v7x
topology: tpu7x:2x2x1
jax: 0.10.0
libtpu: 0.0.40
codegen_flags: <defaults>
</compile_context>

<pallas_src>
import functools

import jax
import jax.numpy as jnp
from jax.experimental import pallas as pl
from jax.experimental.pallas import tpu as pltpu


def _round_up(x, m):
    return ((x + m - 1) // m) * m


def _pad_to(a, shape):
    pads = [(0, s - d) for d, s in zip(a.shape, shape)]
    return jnp.pad(a, pads)


def _block_diagonalize(adj_bnn, num_blocks):
    """(B, N, N) per-graph adjacency -> (num_blocks, gpb*N, gpb*N) block-diag."""
    b, n, _ = adj_bnn.shape
    gpb = b // num_blocks
    a = adj_bnn.reshape(num_blocks, gpb, n, n)
    eye = jnp.eye(gpb, dtype=adj_bnn.dtype)
    # big[blk, g, i, h, j] = a[blk, g, i, j] * eye[g, h]
    big = a[:, :, :, None, :] * eye[None, :, None, :, None]
    return big.reshape(num_blocks, gpb * n, gpb * n)


def _pool_matrix(gpb, n, g_rows, dtype=jnp.float32):
    """(g_rows, gpb*n): row r holds 1/n over graph r's nodes (mean_nodes)."""
    rows = jnp.arange(g_rows)[:, None]
    cols = jnp.arange(gpb * n)[None, :] // n
    return jnp.where(rows == cols, 1.0 / n, 0.0).astype(dtype)


def _sage_kernel(adj_ref, x_ref, pool_ref,
                 w1s_ref, w1n_ref, w2s_ref, w2n_ref, wfc_ref,
                 o_ref, *, activation):
    adj = adj_ref[...]                     # (GN, GN) f32, block-diag, row-normalized
    x = x_ref[...]                         # (GN, F)  f32

    # ---- SAGEConv 1 (mean aggregator, no bias): relu(x@Ws + (A@x)@Wn) ----
    neigh1 = jnp.dot(adj, x, preferred_element_type=jnp.float32)             # (GN, F)
    h1 = (jnp.dot(x, w1s_ref[...], preferred_element_type=jnp.float32)
          + jnp.dot(neigh1, w1n_ref[...], preferred_element_type=jnp.float32))
    h1 = jnp.maximum(h1, 0.0)                                                # (GN, D)

    # ---- SAGEConv 2 ----
    neigh2 = jnp.dot(adj, h1, preferred_element_type=jnp.float32)            # (GN, D)
    h2 = (jnp.dot(h1, w2s_ref[...], preferred_element_type=jnp.float32)
          + jnp.dot(neigh2, w2n_ref[...], preferred_element_type=jnp.float32))

    # ---- dgl.mean_nodes (pooling matmul) + fc1 + activation, batched ----
    g = jnp.dot(pool_ref[...], h2, preferred_element_type=jnp.float32)       # (g_rows, D)
    y = jnp.dot(g, wfc_ref[...], preferred_element_type=jnp.float32)         # (g_rows, Op)
    if activation == "sigmoid":
        y = jax.nn.sigmoid(y)
    elif activation == "tanh":
        y = jnp.tanh(y)
    elif activation == "relu":
        y = jnp.maximum(y, 0.0)
    else:
        raise ValueError(f"unsupported activation: {activation}")
    o_ref[...] = y                          # single unmasked (g_rows, 128) store


@functools.partial(jax.jit, static_argnames=("activation", "num_blocks"))
def net_graphsage_forward(adj_norm, feats, w1_self, w1_neigh, w2_self, w2_neigh,
                          w_fc, *, activation="sigmoid", num_blocks=None):
    """adj_norm: (B, N, N) or (N, N) row-normalized (in-degree mean, zero rows for
    isolated nodes == DGL behaviour); feats: (B, N, F) or (N, F).
    Weights stored pre-transposed as (in, out).  Returns (B, O)."""
    if adj_norm.ndim == 2:
        adj_norm, feats = adj_norm[None], feats[None]
    b, n, f = feats.shape
    d = w1_self.shape[1]
    o = w_fc.shape[1]

    # 2 blocks -> both v7x TensorCores get half the batch; ~free extra step on
    # v5e/v6e (single TC).  Falls back to one monolithic block if B is odd.
    if num_blocks is None:
        num_blocks = 2 if (b % 2 == 0 and b >= 2) else 1
    if b % num_blocks != 0:
        num_blocks = 1
    gpb = b // num_blocks                 # graphs per block
    gn = gpb * n                          # nodes per block (MXU row count)
    g_rows = _round_up(gpb, 8)            # sublane-dense readout rows
    o_pad = _round_up(o, 128)             # lane-dense HBM output store

    adj_blk = _block_diagonalize(adj_norm.astype(jnp.float32), num_blocks)   # (nb,gn,gn)
    x_blk = feats.astype(jnp.float32).reshape(num_blocks, gn, f)             # (nb,gn,f)
    pool = _pool_matrix(gpb, n, g_rows)                                      # (g_rows,gn)
    wfc_p = _pad_to(w_fc.astype(jnp.float32), (d, o_pad))                    # (d, o_pad)
    w1s = w1_self.astype(jnp.float32)
    w1n = w1_neigh.astype(jnp.float32)
    w2s = w2_self.astype(jnp.float32)
    w2n = w2_neigh.astype(jnp.float32)

    flops_block = (2 * gn * gn * f                 # adj @ x
                   + 2 * gn * f * d * 2            # x@W1s + neigh1@W1n
                   + 2 * gn * gn * d               # adj @ h1
                   + 2 * gn * d * d * 2            # h1@W2s + neigh2@W2n
                   + 2 * g_rows * gn * d           # pool @ h2
                   + 2 * g_rows * d * o_pad)       # g @ Wfc
    cost = pl.CostEstimate(
        flops=num_blocks * flops_block,
        transcendentals=(num_blocks * g_rows * o_pad
                         if activation in ("sigmoid", "tanh") else 0),
        bytes_accessed=4 * (adj_blk.size + x_blk.size + pool.size
                            + w1s.size + w1n.size + w2s.size + w2n.size
                            + wfc_p.size + num_blocks * g_rows * o_pad),
    )

    kernel = functools.partial(_sage_kernel, activation=activation)
    out = pl.pallas_call(
        kernel,
        out_shape=jax.ShapeDtypeStruct((num_blocks, g_rows, o_pad), jnp.float32),
        grid_spec=pltpu.PrefetchScalarGridSpec(
            num_scalar_prefetch=0,
            grid=(num_blocks,),
            in_specs=[
                pl.BlockSpec((None, gn, gn), lambda i: (i, 0, 0)),   # block-diag adj
                pl.BlockSpec((None, gn, f), lambda i: (i, 0, 0)),    # feats slab
                pl.BlockSpec((g_rows, gn), lambda i: (0, 0)),        # mean_nodes pooling
                pl.BlockSpec((f, d), lambda i: (0, 0)),              # W1_self  (resident)
                pl.BlockSpec((f, d), lambda i: (0, 0)),              # W1_neigh (resident)
                pl.BlockSpec((d, d), lambda i: (0, 0)),              # W2_self  (resident)
                pl.BlockSpec((d, d), lambda i: (0, 0)),              # W2_neigh (resident)
                pl.BlockSpec((d, o_pad), lambda i: (0, 0)),          # W_fc     (resident)
            ],
            out_specs=pl.BlockSpec((None, g_rows, o_pad), lambda i: (i, 0, 0)),
        ),
        compiler_params=pltpu.CompilerParams(
            dimension_semantics=("parallel",),    # 2 TCs on v7x; harmless on v5e/v6e
        ),
        cost_estimate=cost,
    )(adj_blk, x_blk, pool, w1s, w1n, w2s, w2n, wfc_p)

    return out[:, :gpb, :o].reshape(b, o)


def build_mean_adjacency(key, n_graphs, n_nodes, edge_prob=0.3):
    """Dense directed adjacency per graph, row-normalized by in-degree (DGL 'mean')."""
    a = (jax.random.uniform(key, (n_graphs, n_nodes, n_nodes)) < edge_prob)
    a = a.astype(jnp.float32) * (1.0 - jnp.eye(n_nodes, dtype=jnp.float32))
    deg = jnp.sum(a, axis=-1, keepdims=True)
    return jnp.where(deg > 0, a / jnp.maximum(deg, 1.0), 0.0)


def _reference(adj, x, w1s, w1n, w2s, w2n, wfc, activation):
    """Pure-JAX f32 reference matching the torch/DGL forward."""
    neigh1 = jnp.einsum("bij,bjf->bif", adj, x)
    h1 = jax.nn.relu(x @ w1s + neigh1 @ w1n)
    neigh2 = jnp.einsum("bij,bjd->bid", adj, h1)
    h2 = h1 @ w2s + neigh2 @ w2n
    g = jnp.mean(h2, axis=1)
    y = g @ wfc
    act = {"sigmoid": jax.nn.sigmoid, "tanh": jnp.tanh,
           "relu": lambda v: jnp.maximum(v, 0.0)}[activation]
    return act(y)


if __name__ == "__main__":
    # Small synthetic sizes consistent with the module's forward (batched graphs).
    B = 8                 # graphs in the batch
    N_NODES = 32          # nodes per graph
    NUM_FEATURES = 16     # input feature size
    DIM = 32              # hidden dim of both SAGEConv layers
    OUTPUT_SIZE = 8       # fc1 output size
    ACTIVATION = "sigmoid"

    key = jax.random.PRNGKey(0)
    k_adj, k_x, k1, k2, k3, k4, k5 = jax.random.split(key, 7)

    adj_norm = build_mean_adjacency(k_adj, B, N_NODES)
    feats = jax.random.normal(k_x, (B, N_NODES, NUM_FEATURES), dtype=jnp.float32)

    scale = 0.1
    w1_self = scale * jax.random.normal(k1, (NUM_FEATURES, DIM), dtype=jnp.float32)
    w1_neigh = scale * jax.random.normal(k2, (NUM_FEATURES, DIM), dtype=jnp.float32)
    w2_self = scale * jax.random.normal(k3, (DIM, DIM), dtype=jnp.float32)
    w2_neigh = scale * jax.random.normal(k4, (DIM, DIM), dtype=jnp.float32)
    w_fc = scale * jax.random.normal(k5, (DIM, OUTPUT_SIZE), dtype=jnp.float32)

    out = net_graphsage_forward(adj_norm, feats, w1_self, w1_neigh,
                                w2_self, w2_neigh, w_fc, activation=ACTIVATION)
    out = jax.block_until_ready(out)
    assert out.shape == (B, OUTPUT_SIZE), out.shape

    ref = _reference(adj_norm, feats, w1_self, w1_neigh, w2_self, w2_neigh,
                     w_fc, ACTIVATION)
    max_err = float(jnp.max(jnp.abs(out - ref)))
    # f32 storage throughout; slack only for MXU matmul pass precision.
    assert max_err < 2e-2, f"mismatch vs f32 reference: {max_err}"
    print("KERNEL_OK")
</pallas_src>

<mosaic_0001>
module attributes {stable_mosaic.version = 11 : i64} {
  func.func @_sage_kernel(%arg0: i32, %arg1: memref<1x128x128xf32, #tpu.memory_space<vmem>>, %arg2: memref<1x128x16xf32, #tpu.memory_space<vmem>>, %arg3: memref<8x128xf32, #tpu.memory_space<vmem>>, %arg4: memref<16x32xf32, #tpu.memory_space<vmem>>, %arg5: memref<16x32xf32, #tpu.memory_space<vmem>>, %arg6: memref<32x32xf32, #tpu.memory_space<vmem>>, %arg7: memref<32x32xf32, #tpu.memory_space<vmem>>, %arg8: memref<32x128xf32, #tpu.memory_space<vmem>>, %arg9: memref<1x8x128xf32, #tpu.memory_space<vmem>>) attributes {dimension_semantics = [#tpu.dimension_semantics<parallel>], iteration_bounds = array<i64: 2>, scalar_prefetch = 0 : i64, scratch_operands = 0 : i64, tpu.core_type = #tpu.core_type<tc>, window_params = [{transform_indices = @transform_0, window_bounds = array<i64: 1, 128, 128>}, {transform_indices = @transform_1, window_bounds = array<i64: 1, 128, 16>}, {pipeline_mode = #tpu.pipeline_mode<synchronous>, transform_indices = @transform_2, window_bounds = array<i64: 8, 128>}, {pipeline_mode = #tpu.pipeline_mode<synchronous>, transform_indices = @transform_3, window_bounds = array<i64: 16, 32>}, {pipeline_mode = #tpu.pipeline_mode<synchronous>, transform_indices = @transform_4, window_bounds = array<i64: 16, 32>}, {pipeline_mode = #tpu.pipeline_mode<synchronous>, transform_indices = @transform_5, window_bounds = array<i64: 32, 32>}, {pipeline_mode = #tpu.pipeline_mode<synchronous>, transform_indices = @transform_6, window_bounds = array<i64: 32, 32>}, {pipeline_mode = #tpu.pipeline_mode<synchronous>, transform_indices = @transform_7, window_bounds = array<i64: 32, 128>}, {transform_indices = @transform_8, window_bounds = array<i64: 1, 8, 128>}]} {
    %c0 = arith.constant 0 : index
    %c0_0 = arith.constant 0 : index
    %c0_1 = arith.constant 0 : index
    %0 = vector.load %arg1[%c0, %c0_0, %c0_1] : memref<1x128x128xf32, #tpu.memory_space<vmem>>, vector<1x128x128xf32>
    %1 = vector.shape_cast %0 : vector<1x128x128xf32> to vector<128x128xf32>
    %c0_2 = arith.constant 0 : index
    %c0_3 = arith.constant 0 : index
    %c0_4 = arith.constant 0 : index
    %2 = vector.load %arg2[%c0_2, %c0_3, %c0_4] : memref<1x128x16xf32, #tpu.memory_space<vmem>>, vector<1x128x16xf32>
    %3 = vector.shape_cast %2 : vector<1x128x16xf32> to vector<128x16xf32>
    %cst = arith.constant dense<0.000000e+00> : vector<128x16xf32>
    %4 = tpu.matmul %1, %3, %cst {dimension_numbers = #tpu.dot_dimension_numbers<[1], [0], [0], [1], [0, 0, 1, 1], [], []>} : vector<128x128xf32>, vector<128x16xf32>, vector<128x16xf32> -> vector<128x16xf32>
    %c0_5 = arith.constant 0 : index
    %c0_6 = arith.constant 0 : index
    %5 = vector.load %arg4[%c0_5, %c0_6] : memref<16x32xf32, #tpu.memory_space<vmem>>, vector<16x32xf32>
    %cst_7 = arith.constant dense<0.000000e+00> : vector<128x32xf32>
    %6 = tpu.matmul %3, %5, %cst_7 {dimension_numbers = #tpu.dot_dimension_numbers<[1], [0], [0], [1], [0, 0, 1, 1], [], []>} : vector<128x16xf32>, vector<16x32xf32>, vector<128x32xf32> -> vector<128x32xf32>
    %c0_8 = arith.constant 0 : index
    %c0_9 = arith.constant 0 : index
    %7 = vector.load %arg5[%c0_8, %c0_9] : memref<16x32xf32, #tpu.memory_space<vmem>>, vector<16x32xf32>
    %cst_10 = arith.constant dense<0.000000e+00> : vector<128x32xf32>
    %8 = tpu.matmul %4, %7, %cst_10 {dimension_numbers = #tpu.dot_dimension_numbers<[1], [0], [0], [1], [0, 0, 1, 1], [], []>} : vector<128x16xf32>, vector<16x32xf32>, vector<128x32xf32> -> vector<128x32xf32>
    %9 = arith.addf %6, %8 : vector<128x32xf32>
    %cst_11 = arith.constant 0.000000e+00 : f32
    %10 = vector.broadcast %cst_11 : f32 to vector<128x32xf32>
    %11 = arith.maximumf %9, %10 : vector<128x32xf32>
    %cst_12 = arith.constant dense<0.000000e+00> : vector<128x32xf32>
    %12 = tpu.matmul %1, %11, %cst_12 {dimension_numbers = #tpu.dot_dimension_numbers<[1], [0], [0], [1], [0, 0, 1, 1], [], []>} : vector<128x128xf32>, vector<128x32xf32>, vector<128x32xf32> -> vector<128x32xf32>
    %c0_13 = arith.constant 0 : index
    %c0_14 = arith.constant 0 : index
    %13 = vector.load %arg6[%c0_13, %c0_14] : memref<32x32xf32, #tpu.memory_space<vmem>>, vector<32x32xf32>
    %cst_15 = arith.constant dense<0.000000e+00> : vector<128x32xf32>
    %14 = tpu.matmul %11, %13, %cst_15 {dimension_numbers = #tpu.dot_dimension_numbers<[1], [0], [0], [1], [0, 0, 1, 1], [], []>} : vector<128x32xf32>, vector<32x32xf32>, vector<128x32xf32> -> vector<128x32xf32>
    %c0_16 = arith.constant 0 : index
    %c0_17 = arith.constant 0 : index
    %15 = vector.load %arg7[%c0_16, %c0_17] : memref<32x32xf32, #tpu.memory_space<vmem>>, vector<32x32xf32>
    %cst_18 = arith.constant dense<0.000000e+00> : vector<128x32xf32>
    %16 = tpu.matmul %12, %15, %cst_18 {dimension_numbers = #tpu.dot_dimension_numbers<[1], [0], [0], [1], [0, 0, 1, 1], [], []>} : vector<128x32xf32>, vector<32x32xf32>, vector<128x32xf32> -> vector<128x32xf32>
    %17 = arith.addf %14, %16 : vector<128x32xf32>
    %c0_19 = arith.constant 0 : index
    %c0_20 = arith.constant 0 : index
    %18 = vector.load %arg3[%c0_19, %c0_20] : memref<8x128xf32, #tpu.memory_space<vmem>>, vector<8x128xf32>
    %cst_21 = arith.constant dense<0.000000e+00> : vector<8x32xf32>
    %19 = tpu.matmul %18, %17, %cst_21 {dimension_numbers = #tpu.dot_dimension_numbers<[1], [0], [0], [1], [0, 0, 1, 1], [], []>} : vector<8x128xf32>, vector<128x32xf32>, vector<8x32xf32> -> vector<8x32xf32>
    %c0_22 = arith.constant 0 : index
    %c0_23 = arith.constant 0 : index
    %20 = vector.load %arg8[%c0_22, %c0_23] : memref<32x128xf32, #tpu.memory_space<vmem>>, vector<32x128xf32>
    %cst_24 = arith.constant dense<0.000000e+00> : vector<8x128xf32>
    %21 = tpu.matmul %19, %20, %cst_24 {dimension_numbers = #tpu.dot_dimension_numbers<[1], [0], [0], [1], [0, 0, 1, 1], [], []>} : vector<8x32xf32>, vector<32x128xf32>, vector<8x128xf32> -> vector<8x128xf32>
    %22 = arith.negf %21 : vector<8x128xf32>
    %23 = math.exp %22 : vector<8x128xf32>
    %cst_25 = arith.constant 1.000000e+00 : f32
    %24 = vector.broadcast %cst_25 : f32 to vector<8x128xf32>
    %25 = arith.addf %24, %23 : vector<8x128xf32>
    %26 = arith.divf %24, %25 : vector<8x128xf32>
    %c0_26 = arith.constant 0 : index
    %c0_27 = arith.constant 0 : index
    %c0_28 = arith.constant 0 : index
    %27 = vector.load %arg9[%c0_26, %c0_27, %c0_28] : memref<1x8x128xf32, #tpu.memory_space<vmem>>, vector<1x8x128xf32>
    %28 = vector.shape_cast %27 : vector<1x8x128xf32> to vector<8x128xf32>
    %29 = vector.shape_cast %26 : vector<8x128xf32> to vector<1x8x128xf32>
    tpu.vector_store %arg9[%c0_26, %c0_27, %c0_28], %29 {strides = array<i32>} : memref<1x8x128xf32, #tpu.memory_space<vmem>>, vector<1x8x128xf32>,
    return
  }
  func.func @transform_0(%arg0: i32) -> (i32, i32, i32) {
    %c0_i32 = arith.constant 0 : i32
    %c0_i32_0 = arith.constant 0 : i32
    %c0_i32_1 = arith.constant 0 : i32
    return %arg0, %c0_i32, %c0_i32_0 : i32, i32, i32
  }
  func.func @transform_1(%arg0: i32) -> (i32, i32, i32) {
    %c0_i32 = arith.constant 0 : i32
    %c0_i32_0 = arith.constant 0 : i32
    %c0_i32_1 = arith.constant 0 : i32
    return %arg0, %c0_i32, %c0_i32_0 : i32, i32, i32
  }
  func.func @transform_2(%arg0: i32) -> (i32, i32) {
    %c0_i32 = arith.constant 0 : i32
    %c0_i32_0 = arith.constant 0 : i32
    %c0_i32_1 = arith.constant 0 : i32
    return %c0_i32, %c0_i32_0 : i32, i32
  }
  func.func @transform_3(%arg0: i32) -> (i32, i32) {
    %c0_i32 = arith.constant 0 : i32
    %c0_i32_0 = arith.constant 0 : i32
    %c0_i32_1 = arith.constant 0 : i32
    return %c0_i32, %c0_i32_0 : i32, i32
  }
  func.func @transform_4(%arg0: i32) -> (i32, i32) {
    %c0_i32 = arith.constant 0 : i32
    %c0_i32_0 = arith.constant 0 : i32
    %c0_i32_1 = arith.constant 0 : i32
    return %c0_i32, %c0_i32_0 : i32, i32
  }
  func.func @transform_5(%arg0: i32) -> (i32, i32) {
    %c0_i32 = arith.constant 0 : i32
    %c0_i32_0 = arith.constant 0 : i32
    %c0_i32_1 = arith.constant 0 : i32
    return %c0_i32, %c0_i32_0 : i32, i32
  }
  func.func @transform_6(%arg0: i32) -> (i32, i32) {
    %c0_i32 = arith.constant 0 : i32
    %c0_i32_0 = arith.constant 0 : i32
    %c0_i32_1 = arith.constant 0 : i32
    return %c0_i32, %c0_i32_0 : i32, i32
  }
  func.func @transform_7(%arg0: i32) -> (i32, i32) {
    %c0_i32 = arith.constant 0 : i32
    %c0_i32_0 = arith.constant 0 : i32
    %c0_i32_1 = arith.constant 0 : i32
    return %c0_i32, %c0_i32_0 : i32, i32
  }
  func.func @transform_8(%arg0: i32) -> (i32, i32, i32) {
    %c0_i32 = arith.constant 0 : i32
    %c0_i32_0 = arith.constant 0 : i32
    %c0_i32_1 = arith.constant 0 : i32
    return %arg0, %c0_i32, %c0_i32_0 : i32, i32, i32
  }
}

</mosaic_0001>

<bundles_post_ra>
// kernel: net_graphsage_forward.1
= control target key start
LH: loop header
LB: loop body
LE: loop exit
PB: predicated region body
PF: predicated region fallthrough
CT: control target
= control target key end

     0   :  { %s2409_s27 = smov 0   ;;  %s2823_s0 = inlined_call_operand.vmem [shape: f32[2,128,128], index: 0, kind: input, shape index: {}]   ;;  %s2824_s1 = inlined_call_operand.vmem [shape: f32[2,128,16], index: 1, kind: input, shape index: {}]   ;;  %s2825_s2 = inlined_call_operand.vmem [shape: f32[8,128], index: 2, kind: input, shape index: {}]   ;;  %s2826_s3 = inlined_call_operand.vmem [shape: f32[16,32], index: 3, kind: input, shape index: {}]   ;;  %s2827_s4 = inlined_call_operand.vmem [shape: f32[16,32], index: 4, kind: input, shape index: {}]   ;;  %s2828_s5 = inlined_call_operand.vmem [shape: f32[32,32], index: 5, kind: input, shape index: {}]   ;;  %s2829_s6 = inlined_call_operand.vmem [shape: f32[32,32], index: 6, kind: input, shape index: {}]   ;;  %s2830_s7 = inlined_call_operand.vmem [shape: f32[32,128], index: 7, kind: input, shape index: {}]   ;;  %s2831_s8 = inlined_call_operand.vmem [shape: f32[2,8,128], index: 8, kind: output, shape index: {}]  }
   0x1 LB: > { %s1668_s28 = sadd.s32 4294967295, %s2359_s27   ;;  %p1672_p0 = scmp.ge.s32.totalorder %s2359_s27, 1  ;;  %s2359_s27 = sphi %s2409_s27, %s18_s27  }
   0x2   : > { %p272_p1 = scmp.lt.s32.totalorder %s2359_s27, 3 }
   0x4   : > { %p273_p2 = pnand %p1672_p0, %p272_p1 }
   0x5   : > { %p310_p3 = scmp.lt.s32.totalorder (!%p273_p2), %s1668_s28, 1  ;;  %v503_v0 = vld [vmem:[%s2827_s4] sm:$0xff] (!%p273_p2)  ;;  %v504_v1 = vld [vmem:[%s2827_s4 + $0x8] sm:$0xff] (!%p273_p2)  ;;  %vm505_vm0 = vcmask (!%p273_p2), 130048   ;;  %vm1061_vm1 = vcmask (!%p273_p2), 261120   ;;  %vm2362_vm2 = vmmov (!%p273_p2), 0  }
   0x6   : > { %276 = sbr.rel (%p273_p2) target bundleno = 1489 (0x5d1), region = 52  ;;  %v2220_v2 = vpack.c.bf16 (!%p273_p2), %v504_v1, %v503_v0  ;;  %v501_v43 = vld [vmem:[%s2826_s3] sm:$0xff] (!%p273_p2)  ;;  %v502_v44 = vld [vmem:[%s2826_s3 + $0x8] sm:$0xff] (!%p273_p2)  ;;  %v1059_v0 = vld [vmem:[%s2829_s6 + $0x10] sm:$0xff] (!%p273_p2) }
   0x7   : > { %v2224_v45 = vpack.c.bf16 (!%p273_p2), %v502_v44, %v501_v43  ;;  %v1057_v62 = vld [vmem:[%s2829_s6] sm:$0xff] (!%p273_p2)  ;;  %v1058_v63 = vld [vmem:[%s2829_s6 + $0x8] sm:$0xff] (!%p273_p2) }
   0x8   : > { %2221 = vmatprep.subr.bf16.mxu1 (!%p273_p2), %v2220_v2  ;;  %v2260_v1 = vpack.c.bf16 (!%p273_p2), %v1058_v63, %v1057_v62 }
   0x9   : > { %2223 = vmatpush3.bf16.msra.mxu1 (!%p273_p2), %v2220_v2  ;;  %v1060_v2 = vld [vmem:[%s2829_s6 + $0x18] sm:$0xff] (!%p273_p2) }
   0xa   : > { %2225 = vmatprep.subr.bf16.mxu1 (!%p273_p2), %v2224_v45 }
   0xd   : > { %s2833_s28 = smov (!%p310_p3, %s1668_s28), 1 }
   0xe   : > { %s1746_s11 = sshll.u32 %s2833_s28, 7  ;;  %s1677_s30 = sshll.u32 %s2833_s28, 3 }
   0xf   : > { %s2429_s14 = scalar_lea.vmem %s2824_s1, %s1746_s11  ;;  %s2456_s17 = scalar_lea.vmem %s2823_s0, %s1746_s11 }
  0x10   : > { %v2432_v3 = vld [vmem:[%s2429_s14] sm:$0xff]  ;;  %v2435_v4 = vld [vmem:[%s2429_s14 + $0x8] sm:$0xff]  ;;  %v2438_v5 = vld [vmem:[%s2429_s14 + $0x10] sm:$0xff]  ;;  %s323_s11 = scalar_lea.vmem %s2831_s8, %s1677_s30 }
  0x11   : > { %v2188_v6 = vpack.c.bf16 %v2435_v4, %v2432_v3  ;;  %v2443_v7 = vld [vmem:[%s2429_s14 + $0x18] sm:$0xff]  ;;  %v2448_v9 = vld [vmem:[%s2429_s14 + $0x20] sm:$0xff]  ;;  %v2451_v10 = vld [vmem:[%s2429_s14 + $0x28] sm:$0xff] }
  0x12   : > { %v2192_v8 = vpack.c.bf16 %v2443_v7, %v2438_v5  ;;  %v2196_v11 = vpack.c.bf16 %v2451_v10, %v2448_v9  ;;  %v324_v12 = vld [vmem:[%s2456_s17] sm:$0xff]  ;;  %v2462_v13 = vld [vmem:[%s2429_s14 + $0x30] sm:$0xff]  ;;  %v2465_v14 = vld [vmem:[%s2429_s14 + $0x38] sm:$0xff] }
  0x13   : > { %2189 = vmatprep.subr.bf16.mxu0 %v2188_v6  ;;  %1942 = vmatprep.mubr.f32.mxu0 %v324_v12  ;;  %v2200_v15 = vpack.c.bf16 %v2465_v14, %v2462_v13  ;;  %v2470_v16 = vld [vmem:[%s2429_s14 + $0x40] sm:$0xff]  ;;  %v2473_v17 = vld [vmem:[%s2429_s14 + $0x48] sm:$0xff]  ;;  %v2478_v19 = vld [vmem:[%s2429_s14 + $0x50] sm:$0xff] }
  0x14   : > { %2191 = vmatpush3.bf16.msra.mxu0 %v2188_v6  ;;  %v2204_v18 = vpack.c.bf16 %v2473_v17, %v2470_v16  ;;  %v2481_v20 = vld [vmem:[%s2429_s14 + $0x58] sm:$0xff]  ;;  %v2486_v22 = vld [vmem:[%s2429_s14 + $0x60] sm:$0xff]  ;;  %v2489_v23 = vld [vmem:[%s2429_s14 + $0x68] sm:$0xff] }
  0x15   : > { %2193 = vmatprep.subr.bf16.mxu0 %v2192_v8  ;;  %v2208_v21 = vpack.c.bf16 %v2481_v20, %v2478_v19  ;;  %v2212_v24 = vpack.c.bf16 %v2489_v23, %v2486_v22  ;;  %v2494_v25 = vld [vmem:[%s2429_s14 + $0x70] sm:$0xff]  ;;  %v2497_v26 = vld [vmem:[%s2429_s14 + $0x78] sm:$0xff]  ;;  %v2502_v28 = vld [vmem:[%s2456_s17 + $0x8] sm:$0xff] }
  0x16   : > { %v2216_v27 = vpack.c.bf16 %v2497_v26, %v2494_v25  ;;  %v2505_v29 = vld [vmem:[%s2456_s17 + $0x10] sm:$0xff]  ;;  %v2510_v30 = vld [vmem:[%s2456_s17 + $0x18] sm:$0xff]  ;;  %v2513_v31 = vld [vmem:[%s2456_s17 + $0x20] sm:$0xff] }
  0x17   : > { %v2518_v32 = vld [vmem:[%s2456_s17 + $0x28] sm:$0xff]  ;;  %v2521_v33 = vld [vmem:[%s2456_s17 + $0x30] sm:$0xff]  ;;  %v2526_v34 = vld [vmem:[%s2456_s17 + $0x38] sm:$0xff] }
  0x18   : > { %2195 = vmatpush3.bf16.msra.mxu0 %v2192_v8  ;;  %v2529_v35 = vld [vmem:[%s2456_s17 + $0x40] sm:$0xff]  ;;  %v2534_v36 = vld [vmem:[%s2456_s17 + $0x48] sm:$0xff]  ;;  %v2537_v37 = vld [vmem:[%s2456_s17 + $0x50] sm:$0xff] }
  0x19   : > { %2197 = vmatprep.subr.bf16.mxu0 %v2196_v11  ;;  %v2542_v38 = vld [vmem:[%s2456_s17 + $0x58] sm:$0xff]  ;;  %v2545_v39 = vld [vmem:[%s2456_s17 + $0x60] sm:$0xff]  ;;  %v2550_v40 = vld [vmem:[%s2456_s17 + $0x68] sm:$0xff] }
  0x1a   : > { %v2553_v41 = vld [vmem:[%s2456_s17 + $0x70] sm:$0xff]  ;;  %v2558_v42 = vld [vmem:[%s2456_s17 + $0x78] sm:$0xff] }
  0x1c   : > { %2199 = vmatpush3.bf16.msra.mxu0 %v2196_v11 }
  0x1d   : > { %2201 = vmatprep.subr.bf16.mxu0 %v2200_v15 }
  0x20   : > { %2203 = vmatpush3.bf16.msra.mxu0 %v2200_v15 }
  0x21   : > { %2205 = vmatprep.subr.bf16.mxu0 %v2204_v18 }
  0x24   : > { %2207 = vmatpush3.bf16.msra.mxu0 %v2204_v18 }
  0x25   : > { %2209 = vmatprep.subr.bf16.mxu0 %v2208_v21 }
  0x28   : > { %2211 = vmatpush3.bf16.msra.mxu0 %v2208_v21 }
  0x29   : > { %2213 = vmatprep.subr.bf16.mxu0 %v2212_v24 }
  0x2c   : > { %2215 = vmatpush3.bf16.msra.mxu0 %v2212_v24 }
  0x2d   : > { %2217 = vmatprep.subr.bf16.mxu0 %v2216_v27 }
  0x30   : > { %2219 = vmatpush3.bf16.msra.mxu0 %v2216_v27 }
  0x33   : > { %1943 = vmatmul.mubr.f32.vlgmr.msra.gmra.mrb[0].mxu0 %v2502_v28 }
  0x34   : > { %1945 = vmatprep.mubr.f32.mxu0 %v2505_v29 }
  0x37   : > { %1946 = vmatmul.mubr.f32.gmra.mrb[2].mxu0 %v2510_v30 }
  0x38   : > { %1948 = vmatprep.mubr.f32.mxu0 %v2513_v31 }
  0x3b   : > { %1949 = vmatmul.mubr.f32.gmra.mrb[4].mxu0 %v2518_v32 }
  0x3c   : > { %1951 = vmatprep.mubr.f32.mxu0 %v2521_v33 }
  0x3f   : > { %1952 = vmatmul.mubr.f32.gmra.mrb[6].mxu0 %v2526_v34 }
  0x40   : > { %1954 = vmatprep.mubr.f32.mxu0 %v2529_v35 }
  0x43   : > { %1955 = vmatmul.mubr.f32.gmra.mrb[8].mxu0 %v2534_v36 }
  0x44   : > { %1957 = vmatprep.mubr.f32.mxu0 %v2537_v37 }
  0x47   : > { %1958 = vmatmul.mubr.f32.gmra.mrb[10].mxu0 %v2542_v38 }
  0x48   : > { %1960 = vmatprep.mubr.f32.mxu0 %v2545_v39 }
  0x4b   : > { %1961 = vmatmul.mubr.f32.gmra.mrb[12].mxu0 %v2550_v40 }
  0x4c   : > { %1963 = vmatprep.mubr.f32.mxu0 %v2553_v41 }
  0x4f   : > { %1964 = vmatmul.mubr.f32.gmra.mrb[14].mxu0 %v2558_v42 }
  0x50   : > { %2054 = vmatprep.mubr.f32.mxu0 %v324_v12 }
 0x106   : > { %v1944_v46 = vpop.f32.mrb[0].mxu0 }
 0x107   : > { %v422_v47 = vpop.f32.mrb[1].mxu0 }
 0x108   : > { %1970 = vmatprep.mubr.msk.f32.mxu1 %vm505_vm0, %v422_v47 }
 0x109   : > { %1971 = vmatmul.mubr.msk.f32.vlgmr.msra.gmra.mrb[0].mxu1 %vm505_vm0, %v1944_v46 }
 0x10a   : > { %v1947_v48 = vpop.f32.mrb[2].mxu0  ;;  %2227 = vmatpush3.bf16.msra.mxu1 %v2224_v45 }
 0x10b   : > { %v432_v49 = vpop.f32.mrb[3].mxu0  ;;  %2261 = vmatprep.subr.bf16.mxu1 %v2260_v1 }
 0x10c   : > { %1973 = vmatprep.mubr.msk.f32.mxu1 %vm505_vm0, %v432_v49 }
 0x10d   : > { %1974 = vmatmul.mubr.msk.f32.gmra.mrb[2].mxu1 %vm505_vm0, %v1947_v48 }
 0x10e   : > { %v1950_v50 = vpop.f32.mrb[4].mxu0 }
 0x10f   : > { %v442_v51 = vpop.f32.mrb[5].mxu0 }
 0x110   : > { %1976 = vmatprep.mubr.msk.f32.mxu1 %vm505_vm0, %v442_v51 }
 0x111   : > { %1977 = vmatmul.mubr.msk.f32.gmra.mrb[4].mxu1 %vm505_vm0, %v1950_v50 }
 0x112   : > { %v1953_v52 = vpop.f32.mrb[6].mxu0 }
 0x113   : > { %v452_v53 = vpop.f32.mrb[7].mxu0 }
 0x114   : > { %1979 = vmatprep.mubr.msk.f32.mxu1 %vm505_vm0, %v452_v53 }
 0x115   : > { %1980 = vmatmul.mubr.msk.f32.gmra.mrb[6].mxu1 %vm505_vm0, %v1953_v52 }
 0x116   : > { %v1956_v54 = vpop.f32.mrb[8].mxu0 }
 0x117   : > { %v462_v55 = vpop.f32.mrb[9].mxu0 }
 0x118   : > { %1982 = vmatprep.mubr.msk.f32.mxu1 %vm505_vm0, %v462_v55 }
 0x119   : > { %1983 = vmatmul.mubr.msk.f32.gmra.mrb[8].mxu1 %vm505_vm0, %v1956_v54 }
 0x11a   : > { %v1959_v56 = vpop.f32.mrb[10].mxu0 }
 0x11b   : > { %v472_v57 = vpop.f32.mrb[11].mxu0 }
 0x11c   : > { %1985 = vmatprep.mubr.msk.f32.mxu1 %vm505_vm0, %v472_v57 }
 0x11d   : > { %1986 = vmatmul.mubr.msk.f32.gmra.mrb[10].mxu1 %vm505_vm0, %v1959_v56 }
 0x11e   : > { %v1962_v58 = vpop.f32.mrb[12].mxu0 }
 0x11f   : > { %v482_v59 = vpop.f32.mrb[13].mxu0 }
 0x120   : > { %1988 = vmatprep.mubr.msk.f32.mxu1 %vm505_vm0, %v482_v59 }
 0x121   : > { %1989 = vmatmul.mubr.msk.f32.gmra.mrb[12].mxu1 %vm505_vm0, %v1962_v58 }
 0x122   : > { %v1965_v60 = vpop.f32.mrb[14].mxu0 }
 0x123   : > { %v492_v61 = vpop.f32.mrb[15].mxu0 }
 0x124   : > { %1991 = vmatprep.mubr.msk.f32.mxu1 %vm505_vm0, %v492_v61 }
 0x125   : > { %1992 = vmatmul.mubr.msk.f32.gmra.mrb[14].mxu1 %vm505_vm0, %v1965_v60 }
 0x126   : > { %1998 = vmatprep.mubr.msk.f32.mxu1 %vm505_vm0, %v2432_v3  ;;  %v2264_v3 = vpack.c.bf16 %v1060_v2, %v1059_v0  ;;  %v2361_v2 = vmov 0.0|0.0  }
 0x129   : > { %1999 = vmatmul.mubr.msk.f32.vlgmr.msra.gmra.mrb[0].mxu1 %vm505_vm0, %v2435_v4 }
 0x12a   : > { %2001 = vmatprep.mubr.msk.f32.mxu1 %vm505_vm0, %v2438_v5  ;;  %2263 = vmatpush3.bf16.msra.mxu1 %v2260_v1 }
 0x12b   : > { %2265 = vmatprep.subr.bf16.mxu1 %v2264_v3 }
 0x12d   : > { %2002 = vmatmul.mubr.msk.f32.gmra.mrb[2].mxu1 %vm505_vm0, %v2443_v7 }
 0x12e   : > { %2004 = vmatprep.mubr.msk.f32.mxu1 %vm505_vm0, %v2448_v9  ;;  %2267 = vmatpush3.bf16.msra.mxu1 %v2264_v3  ;;  %v2363_v3 = vmov 0.0  }
 0x131   : > { %2005 = vmatmul.mubr.msk.f32.gmra.mrb[4].mxu1 %vm505_vm0, %v2451_v10 }
 0x132   : > { %2007 = vmatprep.mubr.msk.f32.mxu1 %vm505_vm0, %v2462_v13 }
 0x135   : > { %2008 = vmatmul.mubr.msk.f32.gmra.mrb[6].mxu1 %vm505_vm0, %v2465_v14 }
 0x136   : > { %2010 = vmatprep.mubr.msk.f32.mxu1 %vm505_vm0, %v2470_v16 }
 0x139   : > { %2011 = vmatmul.mubr.msk.f32.gmra.mrb[8].mxu1 %vm505_vm0, %v2473_v17 }
 0x13a   : > { %2013 = vmatprep.mubr.msk.f32.mxu1 %vm505_vm0, %v2478_v19 }
 0x13d   : > { %2014 = vmatmul.mubr.msk.f32.gmra.mrb[10].mxu1 %vm505_vm0, %v2481_v20 }
 0x13e   : > { %2016 = vmatprep.mubr.msk.f32.mxu1 %vm505_vm0, %v2486_v22 }
 0x141   : > { %2017 = vmatmul.mubr.msk.f32.gmra.mrb[12].mxu1 %vm505_vm0, %v2489_v23 }
 0x142   : > { %2019 = vmatprep.mubr.msk.f32.mxu1 %vm505_vm0, %v2494_v25 }
 0x145   : > { %2020 = vmatmul.mubr.msk.f32.gmra.mrb[14].mxu1 %vm505_vm0, %v2497_v26 }
 0x1fc   : > { %v2627_v4 = vpop.f32.mrb[0].mxu1 }
 0x1fd   : > { %v893_v5 = vmax.f32 %v2627_v4, 0.0  ;;  %v2630_v6 = vpop.f32.mrb[1].mxu1 }
 0x1fe   : > { %v892_v7 = vmax.f32 %v2630_v6, 0.0 }
 0x200   : > { %v2228_v8 = vpack.c.bf16 %v893_v5, %v892_v7  ;;  %v2637_v9 = vpop.f32.mrb[2].mxu1 }
 0x201   : > { %v895_v10 = vmax.f32 %v2637_v9, 0.0  ;;  %v2640_v11 = vpop.f32.mrb[3].mxu1 }
 0x202   : > { %v894_v12 = vmax.f32 %v2640_v11, 0.0  ;;  %2229 = vmatprep.subr.bf16.mxu0 %v2228_v8 }
 0x203   : > { %2231 = vmatpush3.bf16.msra.mxu0 %v2228_v8 }
 0x204   : > { %v2232_v13 = vpack.c.bf16 %v895_v10, %v894_v12  ;;  %v2647_v14 = vpop.f32.mrb[4].mxu1 }
 0x205   : > { %v897_v15 = vmax.f32 %v2647_v14, 0.0  ;;  %v2650_v16 = vpop.f32.mrb[5].mxu1 }
 0x206   : > { %v896_v17 = vmax.f32 %v2650_v16, 0.0  ;;  %2233 = vmatprep.subr.bf16.mxu0 %v2232_v13 }
 0x207   : > { %2235 = vmatpush3.bf16.msra.mxu0 %v2232_v13 }
 0x208   : > { %v2236_v18 = vpack.c.bf16 %v897_v15, %v896_v17  ;;  %v2657_v19 = vpop.f32.mrb[6].mxu1 }
 0x209   : > { %v899_v20 = vmax.f32 %v2657_v19, 0.0  ;;  %v2660_v21 = vpop.f32.mrb[7].mxu1 }
 0x20a   : > { %v898_v22 = vmax.f32 %v2660_v21, 0.0  ;;  %2237 = vmatprep.subr.bf16.mxu0 %v2236_v18 }
 0x20b   : > { %2239 = vmatpush3.bf16.msra.mxu0 %v2236_v18 }
 0x20c   : > { %v2240_v23 = vpack.c.bf16 %v899_v20, %v898_v22  ;;  %v2667_v24 = vpop.f32.mrb[8].mxu1 }
 0x20d   : > { %v901_v25 = vmax.f32 %v2667_v24, 0.0  ;;  %v2670_v26 = vpop.f32.mrb[9].mxu1 }
 0x20e   : > { %v900_v27 = vmax.f32 %v2670_v26, 0.0  ;;  %2241 = vmatprep.subr.bf16.mxu0 %v2240_v23 }
 0x20f   : > { %2243 = vmatpush3.bf16.msra.mxu0 %v2240_v23 }
 0x210   : > { %v2244_v43 = vpack.c.bf16 %v901_v25, %v900_v27  ;;  %v2677_v44 = vpop.f32.mrb[10].mxu1 }
 0x211   : > { %v903_v45 = vmax.f32 %v2677_v44, 0.0  ;;  %v2680_v46 = vpop.f32.mrb[11].mxu1 }
 0x212   : > { %v902_v47 = vmax.f32 %v2680_v46, 0.0  ;;  %2245 = vmatprep.subr.bf16.mxu0 %v2244_v43 }
 0x213   : > { %2247 = vmatpush3.bf16.msra.mxu0 %v2244_v43  ;;  %v1520_v43 = vld [vmem:[%s2830_s7 + $0x8] sm:$0xff] }
 0x214   : > { %v2248_v48 = vpack.c.bf16 %v903_v45, %v902_v47  ;;  %v2687_v49 = vpop.f32.mrb[12].mxu1 }
 0x215   : > { %v905_v50 = vmax.f32 %v2687_v49, 0.0  ;;  %v2690_v51 = vpop.f32.mrb[13].mxu1 }
 0x216   : > { %v904_v52 = vmax.f32 %v2690_v51, 0.0  ;;  %2249 = vmatprep.subr.bf16.mxu0 %v2248_v48 }
 0x217   : > { %2251 = vmatpush3.bf16.msra.mxu0 %v2248_v48  ;;  %v1522_v48 = vld [vmem:[%s2830_s7 + $0x18] sm:$0xff] }
 0x218   : > { %v2252_v53 = vpack.c.bf16 %v905_v50, %v904_v52  ;;  %v2697_v54 = vpop.f32.mrb[14].mxu1 }
 0x219   : > { %v907_v55 = vmax.f32 %v2697_v54, 0.0  ;;  %v2700_v56 = vpop.f32.mrb[15].mxu1 }
 0x21a   : > { %v906_v57 = vmax.f32 %v2700_v56, 0.0  ;;  %2253 = vmatprep.subr.bf16.mxu0 %v2252_v53 }
 0x21b   : > { %2255 = vmatpush3.bf16.msra.mxu0 %v2252_v53 }
 0x21c   : > { %v2256_v58 = vpack.c.bf16 %v907_v55, %v906_v57 }
 0x21e   : > { %2257 = vmatprep.subr.bf16.mxu0 %v2256_v58 }
 0x21f   : > { %2259 = vmatpush3.bf16.msra.mxu0 %v2256_v58 }
 0x220   : > { %2276 = vmatprep.subr.bf16.mxu0 %v2361_v2 }
 0x222   : > { %2055 = vmatmul.mubr.f32.vlgmr.msra.gmra.mrb[16].mxu0 %v2502_v28  ;;  %v1053_v28 = vld [vmem:[%s2828_s5] sm:$0xff] }
 0x223   : > { %2057 = vmatprep.mubr.f32.mxu0 %v2505_v29  ;;  %v1054_v29 = vld [vmem:[%s2828_s5 + $0x8] sm:$0xff] }
 0x226   : > { %2058 = vmatmul.mubr.f32.gmra.mrb[18].mxu0 %v2510_v30  ;;  %v2268_v30 = vpack.c.bf16 %v1054_v29, %v1053_v28 }
 0x227   : > { %2060 = vmatprep.mubr.f32.mxu0 %v2513_v31  ;;  %v1055_v31 = vld [vmem:[%s2828_s5 + $0x10] sm:$0xff] }
 0x228   : > { %2269 = vmatprep.subr.bf16.mxu1 %v2268_v30 }
 0x22a   : > { %2061 = vmatmul.mubr.f32.gmra.mrb[20].mxu0 %v2518_v32  ;;  %v1056_v32 = vld [vmem:[%s2828_s5 + $0x18] sm:$0xff] }
 0x22b   : > { %2063 = vmatprep.mubr.f32.mxu0 %v2521_v33 }
 0x22e   : > { %2064 = vmatmul.mubr.f32.gmra.mrb[22].mxu0 %v2526_v34 }
 0x22f   : > { %2066 = vmatprep.mubr.f32.mxu0 %v2529_v35  ;;  %v2272_v35 = vpack.c.bf16 %v1056_v32, %v1055_v31 }
 0x232   : > { %2067 = vmatmul.mubr.f32.gmra.mrb[24].mxu0 %v2534_v36 }
 0x233   : > { %2069 = vmatprep.mubr.f32.mxu0 %v2537_v37 }
 0x236   : > { %2070 = vmatmul.mubr.f32.gmra.mrb[26].mxu0 %v2542_v38 }
 0x237   : > { %2072 = vmatprep.mubr.f32.mxu0 %v2545_v39 }
 0x23a   : > { %2073 = vmatmul.mubr.f32.gmra.mrb[28].mxu0 %v2550_v40 }
 0x23b   : > { %2075 = vmatprep.mubr.f32.mxu0 %v2553_v41 }
 0x23e   : > { %2076 = vmatmul.mubr.f32.gmra.mrb[30].mxu0 %v2558_v42 }
 0x23f   : > { %2174 = vmatprep.mubr.msk.f32.mxu0 %vm2362_vm2, %v2363_v3 }
 0x2f5   : > { %v2056_v33 = vpop.f32.mrb[16].mxu0 }
 0x2f6   : > { %v974_v34 = vpop.f32.mrb[17].mxu0 }
 0x2f7   : > { %2086 = vmatprep.mubr.msk.f32.mxu1 %vm1061_vm1, %v974_v34 }
 0x2f8   : > { %2087 = vmatmul.mubr.msk.f32.vlgmr.msra.gmra.mrb[16].mxu1 %vm1061_vm1, %v2056_v33 }
 0x2f9   : > { %v2059_v36 = vpop.f32.mrb[18].mxu0  ;;  %2271 = vmatpush3.bf16.msra.mxu1 %v2268_v30 }
 0x2fa   : > { %v984_v37 = vpop.f32.mrb[19].mxu0  ;;  %2273 = vmatprep.subr.bf16.mxu1 %v2272_v35 }
 0x2fb   : > { %2089 = vmatprep.mubr.msk.f32.mxu1 %vm1061_vm1, %v984_v37 }
 0x2fc   : > { %2090 = vmatmul.mubr.msk.f32.gmra.mrb[18].mxu1 %vm1061_vm1, %v2059_v36 }
 0x2fd   : > { %v2062_v38 = vpop.f32.mrb[20].mxu0  ;;  %2275 = vmatpush3.bf16.msra.mxu1 %v2272_v35 }
 0x2fe   : > { %v994_v39 = vpop.f32.mrb[21].mxu0 }
 0x2ff   : > { %2092 = vmatprep.mubr.msk.f32.mxu1 %vm1061_vm1, %v994_v39 }
 0x300   : > { %2093 = vmatmul.mubr.msk.f32.gmra.mrb[20].mxu1 %vm1061_vm1, %v2062_v38 }
 0x301   : > { %v2065_v40 = vpop.f32.mrb[22].mxu0 }
 0x302   : > { %v1004_v41 = vpop.f32.mrb[23].mxu0 }
 0x303   : > { %2095 = vmatprep.mubr.msk.f32.mxu1 %vm1061_vm1, %v1004_v41 }
 0x304   : > { %2096 = vmatmul.mubr.msk.f32.gmra.mrb[22].mxu1 %vm1061_vm1, %v2065_v40 }
 0x305   : > { %v2068_v42 = vpop.f32.mrb[24].mxu0 }
 0x306   : > { %v1014_v59 = vpop.f32.mrb[25].mxu0 }
 0x307   : > { %2098 = vmatprep.mubr.msk.f32.mxu1 %vm1061_vm1, %v1014_v59 }
 0x308   : > { %2099 = vmatmul.mubr.msk.f32.gmra.mrb[24].mxu1 %vm1061_vm1, %v2068_v42 }
 0x309   : > { %v2071_v60 = vpop.f32.mrb[26].mxu0 }
 0x30a   : > { %v1024_v61 = vpop.f32.mrb[27].mxu0 }
 0x30b   : > { %2101 = vmatprep.mubr.msk.f32.mxu1 %vm1061_vm1, %v1024_v61 }
 0x30c   : > { %2102 = vmatmul.mubr.msk.f32.gmra.mrb[26].mxu1 %vm1061_vm1, %v2071_v60 }
 0x30d   : > { %v2074_v62 = vpop.f32.mrb[28].mxu0 }
 0x30e   : > { %v1034_v63 = vpop.f32.mrb[29].mxu0 }
 0x30f   : > { %2104 = vmatprep.mubr.msk.f32.mxu1 %vm1061_vm1, %v1034_v63 }
 0x310   : > { %2105 = vmatmul.mubr.msk.f32.gmra.mrb[28].mxu1 %vm1061_vm1, %v2074_v62 }
 0x311   : > { %v2077_v0 = vpop.f32.mrb[30].mxu0 }
 0x312   : > { %v1044_v1 = vpop.f32.mrb[31].mxu0 }
 0x313   : > { %2107 = vmatprep.mubr.msk.f32.mxu1 %vm1061_vm1, %v1044_v1 }
 0x314   : > { %2108 = vmatmul.mubr.msk.f32.gmra.mrb[30].mxu1 %vm1061_vm1, %v2077_v0 }
 0x315   : > { %2118 = vmatprep.mubr.msk.f32.mxu1 %vm1061_vm1, %v892_v7 }
 0x318   : > { %2119 = vmatmul.mubr.msk.f32.vlgmr.msra.gmra.mrb[16].mxu1 %vm1061_vm1, %v893_v5 }
 0x319   : > { %2121 = vmatprep.mubr.msk.f32.mxu1 %vm1061_vm1, %v894_v12 }
 0x31c   : > { %2122 = vmatmul.mubr.msk.f32.gmra.mrb[18].mxu1 %vm1061_vm1, %v895_v10 }
 0x31d   : > { %2124 = vmatprep.mubr.msk.f32.mxu1 %vm1061_vm1, %v896_v17 }
 0x320   : > { %2125 = vmatmul.mubr.msk.f32.gmra.mrb[20].mxu1 %vm1061_vm1, %v897_v15 }
 0x321   : > { %2127 = vmatprep.mubr.msk.f32.mxu1 %vm1061_vm1, %v898_v22 }
 0x324   : > { %2128 = vmatmul.mubr.msk.f32.gmra.mrb[22].mxu1 %vm1061_vm1, %v899_v20 }
 0x325   : > { %2130 = vmatprep.mubr.msk.f32.mxu1 %vm1061_vm1, %v900_v27  ;;  %v1519_v27 = vld [vmem:[%s2830_s7] sm:$0xff] }
 0x326   : > { %v2301_v46 = vpack.c.bf16 %v1520_v43, %v1519_v27 }
 0x328   : > { %2131 = vmatmul.mubr.msk.f32.gmra.mrb[24].mxu1 %vm1061_vm1, %v901_v25 }
 0x329   : > { %2133 = vmatprep.mubr.msk.f32.mxu1 %vm1061_vm1, %v902_v47  ;;  %v1521_v47 = vld [vmem:[%s2830_s7 + $0x10] sm:$0xff] }
 0x32a   : > { %v2304_v49 = vpack.c.bf16 %v1522_v48, %v1521_v47 }
 0x32c   : > { %2134 = vmatmul.mubr.msk.f32.gmra.mrb[26].mxu1 %vm1061_vm1, %v903_v45  ;;  %v1448_v45 = vld [vmem:[%s2825_s2] sm:$0xff] }
 0x32d   : > { %2136 = vmatprep.mubr.msk.f32.mxu1 %vm1061_vm1, %v904_v52 }
 0x330   : > { %2137 = vmatmul.mubr.msk.f32.gmra.mrb[28].mxu1 %vm1061_vm1, %v905_v50 }
 0x331   : > { %2139 = vmatprep.mubr.msk.f32.mxu1 %vm1061_vm1, %v906_v57 }
 0x334   : > { %2140 = vmatmul.mubr.msk.f32.gmra.mrb[30].mxu1 %vm1061_vm1, %v907_v55 }
 0x3eb   : > { %v2120_v4 = vpop.f32.mrb[16].mxu1 }
 0x3ec   : > { %v1369_v5 = vpop.f32.mrb[17].mxu1 }
 0x3ed   : > { %v2277_v6 = vpack.c.bf16 %v2120_v4, %v1369_v5 }
 0x3ef   : > { %v2123_v7 = vpop.f32.mrb[18].mxu1  ;;  %2278 = vmatpush3.bf16.msra.mxu0 %v2277_v6 }
 0x3f0   : > { %v1379_v8 = vpop.f32.mrb[19].mxu1  ;;  %2279 = vmatprep.subr.bf16.mxu0 %v2361_v2 }
 0x3f1   : > { %v2280_v9 = vpack.c.bf16 %v2123_v7, %v1379_v8 }
 0x3f3   : > { %v2126_v10 = vpop.f32.mrb[20].mxu1  ;;  %2281 = vmatpush3.bf16.msra.mxu0 %v2280_v9 }
 0x3f4   : > { %v1389_v11 = vpop.f32.mrb[21].mxu1  ;;  %2282 = vmatprep.subr.bf16.mxu0 %v2361_v2 }
 0x3f5   : > { %v2283_v12 = vpack.c.bf16 %v2126_v10, %v1389_v11 }
 0x3f7   : > { %v2129_v13 = vpop.f32.mrb[22].mxu1  ;;  %2284 = vmatpush3.bf16.msra.mxu0 %v2283_v12 }
 0x3f8   : > { %v1399_v14 = vpop.f32.mrb[23].mxu1  ;;  %2285 = vmatprep.subr.bf16.mxu0 %v2361_v2 }
 0x3f9   : > { %v2286_v15 = vpack.c.bf16 %v2129_v13, %v1399_v14 }
 0x3fb   : > { %v2132_v16 = vpop.f32.mrb[24].mxu1  ;;  %2287 = vmatpush3.bf16.msra.mxu0 %v2286_v15 }
 0x3fc   : > { %v1409_v17 = vpop.f32.mrb[25].mxu1  ;;  %2288 = vmatprep.subr.bf16.mxu0 %v2361_v2 }
 0x3fd   : > { %v2289_v18 = vpack.c.bf16 %v2132_v16, %v1409_v17 }
 0x3ff   : > { %v2135_v19 = vpop.f32.mrb[26].mxu1  ;;  %2290 = vmatpush3.bf16.msra.mxu0 %v2289_v18 }
 0x400   : > { %v1419_v20 = vpop.f32.mrb[27].mxu1  ;;  %2291 = vmatprep.subr.bf16.mxu0 %v2361_v2 }
 0x401   : > { %v2292_v21 = vpack.c.bf16 %v2135_v19, %v1419_v20 }
 0x403   : > { %v2138_v22 = vpop.f32.mrb[28].mxu1  ;;  %2293 = vmatpush3.bf16.msra.mxu0 %v2292_v21 }
 0x404   : > { %v1429_v23 = vpop.f32.mrb[29].mxu1  ;;  %2294 = vmatprep.subr.bf16.mxu0 %v2361_v2 }
 0x405   : > { %v2295_v24 = vpack.c.bf16 %v2138_v22, %v1429_v23 }
 0x407   : > { %v2141_v25 = vpop.f32.mrb[30].mxu1  ;;  %2296 = vmatpush3.bf16.msra.mxu0 %v2295_v24 }
 0x408   : > { %v1439_v26 = vpop.f32.mrb[31].mxu1  ;;  %2297 = vmatprep.subr.bf16.mxu0 %v2361_v2 }
 0x409   : > { %v2298_v44 = vpack.c.bf16 %v2141_v25, %v1439_v26 }
 0x40b   : > { %2299 = vmatpush3.bf16.msra.mxu0 %v2298_v44 }
 0x40c   : > { %2300 = vmatprep.subr.bf16.mxu0 %v2361_v2 }
 0x40e   : > { %2175 = vmatmul.mubr.f32.vlgmr.msra.gmra.mrb[32].mxu0 %v1448_v45 }
 0x40f   : > { %2302 = vmatpush3.bf16.msra.mxu0 %v2301_v46  ;;  %2185 = vmatprep.mubr.msk.f32.mxu0 %vm2362_vm2, %v2363_v3 }
 0x410   : > { %2303 = vmatprep.subr.bf16.mxu0 %v2361_v2 }
 0x413   : > { %2305 = vmatpush3.bf16.msra.mxu0 %v2304_v49 }
 0x4e1   : > { %v1515_v50 = vpop.f32.mrb[32].mxu0 }
 0x4e2   : > { %v2176_v51 = vpop.f32.mrb[33].mxu0  ;;  %2186 = vmatmul.mubr.msk.f32.vlgmr.msra.gmra.mrb[34].mxu0 %vm1061_vm1, %v1515_v50 }
 0x5b5   : > { %v1592_v52 = vpop.f32.mrb[34].mxu0 }
 0x5b6   : > { %v1743_v53 = vmul.f32 -1.442695, %v1592_v52  ;;  %v2187_v54 = vpop.f32.mrb[35].mxu0 }
 0x5b8   : > { %2349 = vpow2.f32 %v1743_v53 }
 0x5c2   : > { %v2350_v55 = vpop.eup %2349 }
 0x5c3   : > { %v1599_v56 = vadd.f32 1.0, %v2350_v55 }
 0x5c5   : > { %2351 = vrcp.f32 %v1599_v56 }
 0x5cf   : > { %v2352_v57 = vpop.eup %2351 }
 0x5d0   : > { %1602 = vst [vmem:[%s323_s11] sm:$0xff] %v2352_v57 }
 0x5d1 PF: > { %s18_s27 = sadd.s32 1, %s2359_s27  }
 0x5d2   : > { %p15_p4 = scmp.ge.s32.totalorder %s18_s27, 4  }
 0x5d4   :  { %17 = sbr.rel (!%p15_p4) target bundleno = 1 (0x1), region = 85 }

</bundles_post_ra>
